<compile_context>
chip_gen: v5e
topology: v5e:2x2
jax: 0.10.0
libtpu: 0.0.40
codegen_flags: <defaults>
</compile_context>

<pallas_src>
import functools

import jax
import jax.numpy as jnp
from jax.experimental import pallas as pl
from jax.experimental.pallas import tpu as pltpu


def _hloss_kernel(n_rows, use_mxu_reduce, x_ref, o_ref):
    """Per-tile partial entropy sum.

    Per-row entropy of softmax along the class axis:
        H_row = log(s) - sum_j(e_j * z_j) / s,
        z = x - max(x), e = exp(z), s = sum(e)
    which equals -sum_j p_j * log p_j but needs only one full-width
    elementwise product and two row reductions.
    """
    pid = pl.program_id(0)
    x = x_ref[...].astype(jnp.float32)                 # [TB, C]
    tb, c = x.shape

    m = jnp.max(x, axis=1, keepdims=True)              # [TB, 1]
    z = x - m                                          # [TB, C]
    e = jnp.exp(z)                                     # [TB, C]  (EUP)
    ez = e * z                                         # [TB, C]

    if use_mxu_reduce:
        # Row sums on the otherwise-idle MXU: frees VALU slots for the
        # cast/sub/mul chain, which is the binding unit for bf16 inputs on
        # v6e/v7x (review). Neutral-to-irrelevant for f32 so gated on dtype.
        ones = jnp.ones((c, 128), dtype=jnp.float32)
        s = jnp.dot(e, ones, preferred_element_type=jnp.float32)[:, :1]
        sez = jnp.dot(ez, ones, preferred_element_type=jnp.float32)[:, :1]
    else:
        s = jnp.sum(e, axis=1, keepdims=True)          # [TB, 1]
        sez = jnp.sum(ez, axis=1, keepdims=True)       # [TB, 1]

    row_ent = jnp.log(s) - sez / s                     # [TB, 1]; divide on [TB,1] only

    # Mask padded rows of a partial last tile (jnp.where also discards any
    # NaN/inf produced from garbage padded data).
    row_idx = pid * tb + jax.lax.broadcasted_iota(jnp.int32, (tb, 1), 0)
    row_ent = jnp.where(row_idx < n_rows, row_ent, 0.0)

    partial = jnp.sum(row_ent)                         # scalar, f32
    # Lane-dense (1, 8, 128) output block; wrapper reads element [0, 0].
    o_ref[...] = jnp.broadcast_to(partial, o_ref.shape)


def _vmem_plan(n_rows, n_cols, itemsize):
    """Pick (block_rows, vmem_limit_bytes), budgeting the in-kernel f32
    temporaries as well as the double-buffered input block.

    Returns None when even a minimum-height block does not fit the scoped VMEM
    budget (caller falls back to plain XLA).
    """
    try:
        vmem_cap = pltpu.get_tpu_info().vmem_capacity_bytes
    except Exception:
        vmem_cap = 64 * 1024 * 1024            # be conservative if unknown
    if vmem_cap >= 100 * 1024 * 1024:          # v5e / v6e: 128 MiB physical
        scoped = 64 * 1024 * 1024              # bigger blocks amortize ~0.35us/step
        max_rows = 2048
    else:                                      # v7x: 64 MiB per TensorCore
        scoped = 32 * 1024 * 1024
        max_rows = 1024

    # Sublane packing: f32 -> 8, bf16 -> 16, int8/fp8 -> 32 row multiple.
    mult = 8 if itemsize >= 4 else (16 if itemsize == 2 else 32)

    # Per-row VMEM cost of one block: double-buffered input + full-width f32
    # temporaries (z, e, e*z, plus an upcast copy for sub-f32 inputs) + MXU
    # row-sum results ([TB,128] x2) + a handful of lane-padded [TB,1] vectors.
    n_temps = 3 + (1 if itemsize < 4 else 0)
    per_row = (2 * n_cols * itemsize
               + n_temps * n_cols * 4
               + 2 * 128 * 4
               + 8 * 128 * 4)

    fixed = (n_cols * 128 * 4                  # in-kernel ones[C,128] (bf16 path)
             + 2 * 8 * 128 * 4                 # double-buffered output block
             + 2 * 1024 * 1024)                # Mosaic internal scratch slack

    budget = int(scoped * 0.85) - fixed
    if budget <= 0:
        return None
    rows = budget // per_row
    if rows >= n_rows:
        return n_rows, scoped                  # single full block (or full-B blocks)
    if rows < mult:
        return None                            # doesn't fit -> XLA fallback
    rows = min((rows // mult) * mult, max_rows)
    return rows, scoped


def hloss_pallas(x, *, block_rows=None):
    """Entropy loss -sum(softmax(x,1) * log_softmax(x,1)) for 2-D logits [B, C]."""
    B, C = x.shape
    itemsize = jnp.dtype(x.dtype).itemsize
    use_mxu_reduce = itemsize < 4              # bf16/fp16/fp8/int8 -> MXU row sums

    plan = _vmem_plan(B, C, itemsize)
    if plan is None:
        # Even a minimum-height block (+ f32 temporaries) exceeds the scoped
        # VMEM budget (very large C): degrade gracefully instead of failing to
        # compile.
        # TODO(synk): two-pass online-softmax split across C tiles would keep
        # this case on the Pallas path.
        return hloss_ref(x)
    tb_auto, vmem_limit = plan
    tb = block_rows if block_rows is not None else tb_auto
    tb = min(tb, B)
    grid = pl.cdiv(B, tb)

    out = pl.pallas_call(
        functools.partial(_hloss_kernel, B, use_mxu_reduce),
        out_shape=jax.ShapeDtypeStruct((grid, 8, 128), jnp.float32),
        grid_spec=pltpu.PrefetchScalarGridSpec(
            num_scalar_prefetch=0,
            grid=(grid,),
            # Default depth-2 double buffer; bump to pl.Buffered(3) only if a
            # trace shows exposed input DMA at tile boundaries.
            in_specs=[pl.BlockSpec((tb, C), lambda i: (i, 0))],
            out_specs=pl.BlockSpec((1, 8, 128), lambda i: (i, 0, 0)),
        ),
        compiler_params=pltpu.CompilerParams(
            # Independent per-tile partial sums -> batch axis is parallel
            # (lets both v7x TensorCores stream halves of the batch).
            dimension_semantics=("parallel",),
            vmem_limit_bytes=vmem_limit,
        ),
    )(x)
    # Each (8,128) block holds its tile's partial replicated; pick [0, 0].
    return jnp.sum(out[:, 0, 0])


def hloss_ref(x):
    """Pure-JAX reference (mirrors F.softmax * F.log_softmax, summed, negated)."""
    xf = x.astype(jnp.float32)
    return -jnp.sum(jax.nn.softmax(xf, axis=1) * jax.nn.log_softmax(xf, axis=1))


def hloss(x, *, min_pallas_bytes=256 * 1024):
    """Dispatcher: tiny problems go to plain XLA (pallas_call launch overhead
    dominates there); larger ones use the tiled Pallas kernel."""
    if x.size * jnp.dtype(x.dtype).itemsize < min_pallas_bytes:
        return hloss_ref(x)
    return hloss_pallas(x)


if __name__ == "__main__":
    key = jax.random.PRNGKey(0)
    k1, k2, k3 = jax.random.split(key, 3)

    # Case 1: small single-tile logits (the module's [B, C] contract).
    x1 = jax.random.normal(k1, (8, 128), dtype=jnp.float32)
    out1 = hloss_pallas(x1)
    jax.block_until_ready(out1)
    ref1 = hloss_ref(x1)
    assert jnp.allclose(out1, ref1, rtol=1e-5, atol=1e-4), (out1, ref1)

    # Case 2: multi-tile grid with a remainder tile (exercises masking path).
    x2 = jax.random.normal(k2, (300, 256), dtype=jnp.float32)
    out2 = hloss_pallas(x2, block_rows=128)  # grid of 3; last tile has 44 padded rows
    jax.block_until_ready(out2)
    ref2 = hloss_ref(x2)
    assert jnp.allclose(out2, ref2, rtol=1e-5, atol=1e-4), (out2, ref2)

    # Case 3: bf16 input exercises the MXU row-reduction offload path.
    x3 = jax.random.normal(k3, (256, 512), dtype=jnp.float32).astype(jnp.bfloat16)
    out3 = hloss_pallas(x3)
    jax.block_until_ready(out3)
    ref3 = hloss_ref(x3)
    assert jnp.allclose(out3, ref3, rtol=1e-3, atol=1e-2), (out3, ref3)

    # Dispatcher path (tiny input -> XLA fallback).
    out4 = hloss(x1)
    jax.block_until_ready(out4)
    assert jnp.allclose(out4, ref1, rtol=1e-5, atol=1e-4), (out4, ref1)

    print("KERNEL_OK")
</pallas_src>

<mosaic_0001>
module attributes {stable_mosaic.version = 11 : i64} {
  func.func @_hloss_kernel(%arg0: i32, %arg1: memref<8x128xf32, #tpu.memory_space<vmem>>, %arg2: memref<1x8x128xf32, #tpu.memory_space<vmem>>) attributes {dimension_semantics = [#tpu.dimension_semantics<parallel>], iteration_bounds = array<i64: 1>, scalar_prefetch = 0 : i64, scratch_operands = 0 : i64, tpu.core_type = #tpu.core_type<tc>, window_params = [{transform_indices = @transform_0, window_bounds = array<i64: 8, 128>}, {transform_indices = @transform_1, window_bounds = array<i64: 1, 8, 128>}]} {
    %c0 = arith.constant 0 : index
    %c0_0 = arith.constant 0 : index
    %0 = vector.load %arg1[%c0, %c0_0] : memref<8x128xf32, #tpu.memory_space<vmem>>, vector<8x128xf32>
    %cst = arith.constant dense<0xFF800000> : vector<8xf32>
    %1 = vector.multi_reduction <maximumf>, %0, %cst [1] : vector<8x128xf32> to vector<8xf32>
    %2 = vector.shape_cast %1 : vector<8xf32> to vector<8x1xf32>
    %3 = vector.broadcast %2 : vector<8x1xf32> to vector<8x128xf32>
    %4 = arith.subf %0, %3 : vector<8x128xf32>
    %5 = math.exp %4 : vector<8x128xf32>
    %6 = arith.mulf %5, %4 : vector<8x128xf32>
    %cst_1 = arith.constant dense<0.000000e+00> : vector<8xf32>
    %7 = vector.multi_reduction <add>, %5, %cst_1 [1] : vector<8x128xf32> to vector<8xf32>
    %8 = vector.shape_cast %7 : vector<8xf32> to vector<8x1xf32>
    %cst_2 = arith.constant dense<0.000000e+00> : vector<8xf32>
    %9 = vector.multi_reduction <add>, %6, %cst_2 [1] : vector<8x128xf32> to vector<8xf32>
    %10 = vector.shape_cast %9 : vector<8xf32> to vector<8x1xf32>
    %11 = math.log %8 : vector<8x1xf32>
    %12 = arith.divf %10, %8 : vector<8x1xf32>
    %13 = arith.subf %11, %12 : vector<8x1xf32>
    %c8_i32 = arith.constant 8 : i32
    %14 = arith.muli %arg0, %c8_i32 : i32
    %15 = tpu.iota {dimensions = array<i32: 0>} : vector<8x1xi32>
    %16 = vector.broadcast %14 : i32 to vector<8x1xi32>
    %17 = arith.addi %16, %15 : vector<8x1xi32>
    %c8_i32_3 = arith.constant 8 : i32
    %18 = vector.broadcast %c8_i32_3 : i32 to vector<8x1xi32>
    %19 = arith.cmpi slt, %17, %18 : vector<8x1xi32>
    %cst_4 = arith.constant 0.000000e+00 : f32
    %20 = vector.broadcast %cst_4 : f32 to vector<8x1xf32>
    %21 = arith.select %19, %13, %20 : vector<8x1xi1>, vector<8x1xf32>
    %22 = vector.shape_cast %21 : vector<8x1xf32> to vector<1x8x1xf32>
    %cst_5 = arith.constant dense<0.000000e+00> : vector<1xf32>
    %23 = vector.multi_reduction <add>, %22, %cst_5 [1, 2] : vector<1x8x1xf32> to vector<1xf32>
    %24 = vector.shape_cast %23 : vector<1xf32> to vector<1x1x1xf32>
    %25 = vector.extract %24[0, 0, 0] : f32 from vector<1x1x1xf32>
    %26 = vector.broadcast %25 : f32 to vector<1x8x128xf32>
    %c0_6 = arith.constant 0 : index
    %c0_7 = arith.constant 0 : index
    %c0_8 = arith.constant 0 : index
    %27 = vector.load %arg2[%c0_6, %c0_7, %c0_8] : memref<1x8x128xf32, #tpu.memory_space<vmem>>, vector<1x8x128xf32>
    tpu.vector_store %arg2[%c0_6, %c0_7, %c0_8], %26 {strides = array<i32>} : memref<1x8x128xf32, #tpu.memory_space<vmem>>, vector<1x8x128xf32>,
    return
  }
  func.func @transform_0(%arg0: i32) -> (i32, i32) {
    %c0_i32 = arith.constant 0 : i32
    %c0_i32_0 = arith.constant 0 : i32
    return %arg0, %c0_i32 : i32, i32
  }
  func.func @transform_1(%arg0: i32) -> (i32, i32, i32) {
    %c0_i32 = arith.constant 0 : i32
    %c0_i32_0 = arith.constant 0 : i32
    %c0_i32_1 = arith.constant 0 : i32
    return %arg0, %c0_i32, %c0_i32_0 : i32, i32, i32
  }
}

</mosaic_0001>

<bundles_post_ra>
// kernel: tpu_custom_call.1
= control target key start
LH: loop header
LB: loop body
LE: loop exit
PB: predicated region body
PF: predicated region fallthrough
CT: control target
= control target key end

     0   :  { %6 = vsyncpa [#allocation3], 0  ;;  %s169_s0 = inlined_call_operand.hbm [shape: f32[8,128], index: 0, kind: input, shape index: {}]   ;;  %s170_s1 = inlined_call_operand.hbm [shape: f32[1,8,128], index: 1, kind: output, shape index: {}]  }
   0x1   :  { %7 = vsyncpa [#allocation4], 0  ;;  %s13_s8 = sshll.u32 %s169_s0, 4  ;;  %s151_s9 = smov [#allocation2]   ;;  %s14_s8 = int_to_ptr.hbm [resolvable:$true] %s13_s8 }
   0x2   :  { %s15_s10 = sshll.u32 %s151_s9, 4  ;;  %s16_s10 = int_to_ptr.vmem [resolvable:$true] %s15_s10 }
   0x3   :  { %18 = dma.hbm_to_vmem [thread:$0]  %s14_s8, 128, %s16_s10, [#allocation3]  }
   0x4   :  { %147 = dma.done.wait [#allocation3], 128  }
   0x5   :  { %148 = vsyncadd [#allocation3], 4294967168  ;;  %v23_v0 = vld [vmem:[#allocation2] sm:$0xff]  ;;  %vm59_vm4 = vcmask 7168   ;;  %s152_s0 = smov [#allocation5]   ;;  %s79_s14 = sshll.u32 %s170_s1, 4  ;;  %s80_s14 = int_to_ptr.hbm [resolvable:$true] %s79_s14 }
   0x6   :  { %24 = vmax.xlane.f32.xlu0 %v23_v0  ;;  %s77_s11 = sshll.u32 %s152_s0, 4  ;;  %s78_s11 = int_to_ptr.vmem [resolvable:$true] %s77_s11 }
  0x79   :  { %v25_v1 = vpop.xlane.xlu0 %24 }
  0x7a   :  { %v26_v2 = vsub.f32 %v23_v0, %v25_v1 }
  0x7c   :  { %v27_v3 = vmul.f32 1.442695, %v26_v2 }
  0x7e   :  { %93 = vpow2.f32 %v27_v3 }
  0x84   :  { %v94_v4 = vpop.eup %93 }
  0x85   :  { %30 = vadd.xlane.f32.xlu0 %v94_v4  ;;  %v29_v5 = vmul.f32 %v94_v4, %v26_v2 }
  0x87   :  { %32 = vadd.xlane.f32.xlu1 %v29_v5 }
  0xf8   :  { %v31_v6 = vpop.xlane.xlu0 %30 }
  0xf9   :  { %95 = vrcp.f32 %v31_v6  ;;  %v47_v10 = vand.u32 2147483648, %v31_v6  ;;  %v45_v12 = vand.u32 2147483647, %v31_v6  ;;  %vm41_vm1 = vweird.f32 %v31_v6 }
  0xfa   :  { %97 = vlog2.f32 %v31_v6  ;;  %v33_v18 = vpop.xlane.xlu1 %32 }
  0xfb   :  { %v48_v15 = vor.u32 1.1754944e-38, %v47_v10  ;;  %vm46_vm3 = vcmp.eq.f32.partialorder %v45_v12, 8.507059e+37 }
  0xff   :  { %v96_v7 = vpop.eup %95 }
 0x100   :  { %v37_v8 = vmul.f32 %v96_v7, %v31_v6  ;;  %vm42_vm0 = vweird.f32 %v96_v7  ;;  %v98_v14 = vpop.eup %97 }
 0x101   :  { %vm43_vm2 = vmor %vm41_vm1, %vm42_vm0  ;;  %v35_v20 = vmul.f32 0.6931472, %v98_v14 }
 0x102   :  { %v38_v9 = vsub.f32 1.0, %v37_v8 }
 0x104   :  { %v39_v11 = vmul.f32 %v96_v7, %v38_v9 }
 0x106   :  { %v40_v13 = vadd.f32 %v96_v7, %v39_v11 }
 0x108   :  { %v44_v16 = vsel %vm43_vm2, %v96_v7, %v40_v13 }
 0x109   :  { %v49_v17 = vsel %vm46_vm3, %v48_v15, %v44_v16 }
 0x10a   :  { %v50_v19 = vmul.f32 %v49_v17, %v33_v18 }
 0x10c   :  { %v51_v21 = vsub.f32 %v35_v20, %v50_v19 }
 0x10e   :  { %v60_v22 = vsel %vm59_vm4, %v51_v21, 0.0 }
 0x10f   :  { %61 = vadd.xlane.f32.xlu1 %v60_v22 }
 0x182   :  { %v62_v23 = vpop.xlane.xlu1 %61 }
 0x183   :  { %v63_v24 = vrot.slane %v62_v23, 4 }
 0x185   :  { %v64_v25 = vadd.f32 %v63_v24, %v62_v23 }
 0x187   :  { %v65_v26 = vrot.slane %v64_v25, 2 }
 0x189   :  { %v66_v27 = vadd.f32 %v65_v26, %v64_v25 }
 0x18b   :  { %v67_v28 = vrot.slane %v66_v27, 1 }
 0x18d   :  { %v68_v29 = vadd.f32 %v67_v28, %v66_v27 }
 0x18f   :  { %89 = vpush %v68_v29 }
 0x1c0   :  { %s90_s15 = spop %89 }
 0x1c1   :  { %v70_v30 = vstv %s90_s15 }
 0x1c2   :  { %71 = vst [vmem:[#allocation5] sm:$0xff] %v70_v30 }
 0x1c3   :  { %82 = dma.vmem_to_hbm [thread:$0]  %s78_s11, 128, %s80_s14, [#allocation4]  }
 0x1c4   :  { %149 = dma.done.wait [#allocation4], 128  }
 0x1c5   :  { %150 = vsyncadd [#allocation4], 4294967168 }
 0x1c6   :  { %87 = vsyncpa [#allocation3], 1 }
 0x1c7   :  { %88 = vsyncpa [#allocation4], 1 }

</bundles_post_ra>
